<compile_context>
chip_gen: v7x
topology: tpu7x:2x2x1
jax: 0.10.0
libtpu: 0.0.40
codegen_flags: <defaults>
</compile_context>

<pallas_src>
import functools

import jax
import jax.numpy as jnp
from jax.experimental import pallas as pl
from jax.experimental.pallas import tpu as pltpu


def _round_up(x, m):
    return (x + m - 1) // m * m


def _pad2(a, rows, cols):
    pr, pc = rows - a.shape[0], cols - a.shape[1]
    if pr == 0 and pc == 0:
        return a
    return jnp.pad(a, ((0, pr), (0, pc)))


def _softplus(x):
    # log1p(exp(x)) with an overflow guard; identical to the naive form for
    # x < 20 (covers the (-3, 0.1) rho init) and exact-to-fp32 for x >= 20.
    return jnp.where(x > 20.0, x, jnp.log1p(jnp.exp(jnp.minimum(x, 20.0))))


# ----------------------------------------------------------------------------
# Kernels
# ----------------------------------------------------------------------------

def _reparam_weight_kernel(mu_ref, rho_ref, eps_ref, w_ref):
    # Elementwise weight sampling over one (tk, tn) tile of the (I, O) params.
    w_ref[...] = mu_ref[...] + eps_ref[...] * _softplus(rho_ref[...])


def _matmul_bias_kernel(x_ref, w_ref, b_ref, o_ref, acc_ref):
    # Plain x(tm,tk) @ W(tk,tn) + bias with an f32 VMEM accumulator.
    k = pl.program_id(2)

    @pl.when(k == 0)
    def _init():
        acc_ref[...] = jnp.zeros_like(acc_ref)

    acc_ref[...] += jnp.dot(x_ref[...], w_ref[...],
                            preferred_element_type=jnp.float32)

    @pl.when(k == pl.num_programs(2) - 1)
    def _finalize():
        o_ref[...] = (acc_ref[...] + b_ref[...]).astype(o_ref.dtype)


def _fused_bbb_kernel(x_ref, mu_ref, rho_ref, eps_ref, b_ref, o_ref, acc_ref):
    # Fused reparameterization + matmul: used only when there is a single
    # batch tile, i.e. each weight tile is streamed exactly once anyway.
    k = pl.program_id(2)

    @pl.when(k == 0)
    def _init():
        acc_ref[...] = jnp.zeros_like(acc_ref)

    weight = mu_ref[...] + eps_ref[...] * _softplus(rho_ref[...])   # (tk, tn)
    acc_ref[...] += jnp.dot(x_ref[...], weight,
                            preferred_element_type=jnp.float32)

    @pl.when(k == pl.num_programs(2) - 1)
    def _finalize():
        o_ref[...] = (acc_ref[...] + b_ref[...]).astype(o_ref.dtype)


# ----------------------------------------------------------------------------
# Wrapper
# ----------------------------------------------------------------------------

_VMEM_LIMIT = 24 * 1024 * 1024   # explicit; footprints below are < 8 MiB


@functools.partial(jax.jit, static_argnames=("tn", "tk"))
def bbb_linear_forward(x, W_mu_io, W_rho_io, W_eps_io,
                       bias_mu, bias_rho, bias_eps, *, tn=256, tk=1024):
    """Sampled Bayesian linear layer.

    Weight-shaped parameters are stored in (in_features, out_features) layout
    (transposed relative to the PyTorch module) so no per-call transpose is
    needed.  Computes x @ (W_mu + W_eps*softplus(W_rho)) + sampled bias.
    """
    B, I = x.shape
    I2, O = W_mu_io.shape
    assert I2 == I

    # Batch tile: 256 for large batches (amortizes weight streaming, fills
    # the 256x256 MXU on v6e/v7x), otherwise 128; clamp to the padded batch.
    tm = 256 if B >= 256 else 128
    tm = min(tm, _round_up(B, 8))
    tn = min(tn, _round_up(O, 128))
    tk = min(tk, _round_up(I, 128))

    Bp, Op, Ip = _round_up(B, tm), _round_up(O, tn), _round_up(I, tk)

    # Zero-padding is exact: padded mu/eps/bias entries are zero, so sampled
    # padded weights/bias are exactly zero; padded rows/cols sliced away.
    xp = _pad2(x, Bp, Ip)
    mu_p = _pad2(W_mu_io, Ip, Op)
    rho_p = _pad2(W_rho_io, Ip, Op)
    eps_p = _pad2(W_eps_io, Ip, Op)

    # Sampled bias precomputed in plain XLA (O-length elementwise, ~free).
    bias = bias_mu + bias_eps * _softplus(bias_rho)
    bias_p = _pad2(bias.reshape(1, O), 1, Op)

    n_batch_tiles = Bp // tm
    grid = (Bp // tm, Op // tn, Ip // tk)

    mm_params = pltpu.CompilerParams(
        dimension_semantics=("parallel", "parallel", "arbitrary"),
        vmem_limit_bytes=_VMEM_LIMIT)

    if n_batch_tiles == 1:
        # Single batch tile -> fused reparam + matmul (weights streamed once).
        cost = pl.CostEstimate(
            flops=2 * Bp * Ip * Op,
            transcendentals=2 * Ip * Op,
            bytes_accessed=(Bp * Ip + 3 * Ip * Op + Op + Bp * Op) * 4)
        out = pl.pallas_call(
            _fused_bbb_kernel,
            out_shape=jax.ShapeDtypeStruct((Bp, Op), jnp.float32),
            grid_spec=pltpu.PrefetchScalarGridSpec(
                num_scalar_prefetch=0,
                grid=grid,
                in_specs=[
                    pl.BlockSpec((tm, tk), lambda i, j, k: (i, k)),   # x
                    pl.BlockSpec((tk, tn), lambda i, j, k: (k, j)),   # W_mu
                    pl.BlockSpec((tk, tn), lambda i, j, k: (k, j)),   # W_rho
                    pl.BlockSpec((tk, tn), lambda i, j, k: (k, j)),   # W_eps
                    pl.BlockSpec((1, tn), lambda i, j, k: (0, j)),    # bias
                ],
                out_specs=pl.BlockSpec((tm, tn), lambda i, j, k: (i, j)),
                scratch_shapes=[pltpu.VMEM((tm, tn), jnp.float32)],
            ),
            compiler_params=mm_params,
            cost_estimate=cost,
        )(xp, mu_p, rho_p, eps_p, bias_p)
    else:
        # Pass 1: materialize the sampled weight once (elementwise, tiled).
        w_cost = pl.CostEstimate(
            flops=2 * Ip * Op,
            transcendentals=2 * Ip * Op,
            bytes_accessed=4 * Ip * Op * 4)
        weight = pl.pallas_call(
            _reparam_weight_kernel,
            out_shape=jax.ShapeDtypeStruct((Ip, Op), jnp.float32),
            grid_spec=pltpu.PrefetchScalarGridSpec(
                num_scalar_prefetch=0,
                grid=(Ip // tk, Op // tn),
                in_specs=[
                    pl.BlockSpec((tk, tn), lambda i, j: (i, j)),   # W_mu
                    pl.BlockSpec((tk, tn), lambda i, j: (i, j)),   # W_rho
                    pl.BlockSpec((tk, tn), lambda i, j: (i, j)),   # W_eps
                ],
                out_specs=pl.BlockSpec((tk, tn), lambda i, j: (i, j)),
            ),
            compiler_params=pltpu.CompilerParams(
                dimension_semantics=("parallel", "parallel"),
                vmem_limit_bytes=_VMEM_LIMIT),
            cost_estimate=w_cost,
        )(mu_p, rho_p, eps_p)

        # Pass 2: plain tiled matmul + bias, streaming ONE weight array.
        mm_cost = pl.CostEstimate(
            flops=2 * Bp * Ip * Op,
            transcendentals=0,
            bytes_accessed=(Bp * Ip + n_batch_tiles * Ip * Op + Op + Bp * Op) * 4)
        out = pl.pallas_call(
            _matmul_bias_kernel,
            out_shape=jax.ShapeDtypeStruct((Bp, Op), jnp.float32),
            grid_spec=pltpu.PrefetchScalarGridSpec(
                num_scalar_prefetch=0,
                grid=grid,
                in_specs=[
                    pl.BlockSpec((tm, tk), lambda i, j, k: (i, k)),   # x
                    pl.BlockSpec((tk, tn), lambda i, j, k: (k, j)),   # weight
                    pl.BlockSpec((1, tn), lambda i, j, k: (0, j)),    # bias
                ],
                out_specs=pl.BlockSpec((tm, tn), lambda i, j, k: (i, j)),
                scratch_shapes=[pltpu.VMEM((tm, tn), jnp.float32)],
            ),
            compiler_params=mm_params,
            cost_estimate=mm_cost,
        )(xp, weight, bias_p)

    return out[:B, :O]


# ----------------------------------------------------------------------------
# Self-test
# ----------------------------------------------------------------------------

def _run_case(key, batch, in_features, out_features):
    kx, kwm, kwr, kbm, kbr, kwe, kbe = jax.random.split(key, 7)

    # Parameter init matching reset_parameters(), but stored in (I, O) layout:
    #   W_mu, bias_mu ~ N(0, 0.1);  W_rho, bias_rho ~ N(-3, 0.1)
    x = jax.random.normal(kx, (batch, in_features), dtype=jnp.float32)
    W_mu_io = 0.0 + 0.1 * jax.random.normal(
        kwm, (in_features, out_features), jnp.float32)
    W_rho_io = -3.0 + 0.1 * jax.random.normal(
        kwr, (in_features, out_features), jnp.float32)
    bias_mu = 0.0 + 0.1 * jax.random.normal(kbm, (out_features,), jnp.float32)
    bias_rho = -3.0 + 0.1 * jax.random.normal(kbr, (out_features,), jnp.float32)

    # Per-forward-call N(0,1) reparameterization noise, drawn directly in the
    # (I, O) storage layout (no transpose needed).
    W_eps_io = jax.random.normal(kwe, (in_features, out_features), jnp.float32)
    bias_eps = jax.random.normal(kbe, (out_features,), jnp.float32)

    y = bbb_linear_forward(x, W_mu_io, W_rho_io, W_eps_io,
                           bias_mu, bias_rho, bias_eps)
    y = jax.block_until_ready(y)

    # Pure-JAX reference (naive softplus matches the guarded one for rho < 20).
    w_sigma = jnp.log1p(jnp.exp(W_rho_io))
    b_sigma = jnp.log1p(jnp.exp(bias_rho))
    weight = W_mu_io + W_eps_io * w_sigma
    bias = bias_mu + bias_eps * b_sigma
    y_ref = x @ weight + bias
    assert y.shape == (batch, out_features)
    assert jnp.allclose(y, y_ref, atol=1e-5, rtol=1e-5)


if __name__ == "__main__":
    key = jax.random.PRNGKey(0)
    k1, k2 = jax.random.split(key)

    # Small case: single batch tile -> fused reparam+matmul kernel.
    _run_case(k1, batch=8, in_features=32, out_features=64)

    # Multi-batch-tile case (Bp/tm > 1) -> precompute-weight + matmul kernels,
    # with padding exercised on all three dims.
    _run_case(k2, batch=192, in_features=160, out_features=96)

    # TODO(synk): kl_loss() (KL of posterior vs prior) is a training-time scalar
    # reduction outside the forward hot path; left in plain JAX if ever needed.

    print("KERNEL_OK")
</pallas_src>

<mosaic_0001>
module attributes {stable_mosaic.version = 11 : i64} {
  func.func @_fused_bbb_kernel(%arg0: i32, %arg1: i32, %arg2: i32, %arg3: memref<8x128xf32, #tpu.memory_space<vmem>>, %arg4: memref<128x128xf32, #tpu.memory_space<vmem>>, %arg5: memref<128x128xf32, #tpu.memory_space<vmem>>, %arg6: memref<128x128xf32, #tpu.memory_space<vmem>>, %arg7: memref<1x128xf32, #tpu.memory_space<vmem>>, %arg8: memref<8x128xf32, #tpu.memory_space<vmem>>, %arg9: memref<8x128xf32, #tpu.memory_space<vmem>>) attributes {dimension_semantics = [#tpu.dimension_semantics<parallel>, #tpu.dimension_semantics<parallel>, #tpu.dimension_semantics<arbitrary>], iteration_bounds = array<i64: 1, 1, 1>, scalar_prefetch = 0 : i64, scratch_operands = 1 : i64, tpu.core_type = #tpu.core_type<tc>, window_params = [{transform_indices = @transform_0, window_bounds = array<i64: 8, 128>}, {transform_indices = @transform_1, window_bounds = array<i64: 128, 128>}, {transform_indices = @transform_2, window_bounds = array<i64: 128, 128>}, {transform_indices = @transform_3, window_bounds = array<i64: 128, 128>}, {transform_indices = @transform_4, window_bounds = array<i64: 1, 128>}, {transform_indices = @transform_5, window_bounds = array<i64: 8, 128>}]} {
    %c0_i32 = arith.constant 0 : i32
    %0 = arith.cmpi eq, %arg2, %c0_i32 : i32
    %1 = arith.extui %0 : i1 to i32
    %c0_i32_0 = arith.constant 0 : i32
    %2 = arith.cmpi ne, %1, %c0_i32_0 : i32
    scf.if %2 {
      %cst_16 = arith.constant 0.000000e+00 : f32
      %23 = vector.broadcast %cst_16 : f32 to vector<8x128xf32>
      %c0_17 = arith.constant 0 : index
      %c0_18 = arith.constant 0 : index
      %24 = vector.load %arg9[%c0_17, %c0_18] : memref<8x128xf32, #tpu.memory_space<vmem>>, vector<8x128xf32>
      tpu.vector_store %arg9[%c0_17, %c0_18], %23 {strides = array<i32>} : memref<8x128xf32, #tpu.memory_space<vmem>>, vector<8x128xf32>,
    } else {
    }
    %c0 = arith.constant 0 : index
    %c0_1 = arith.constant 0 : index
    %3 = vector.load %arg4[%c0, %c0_1] : memref<128x128xf32, #tpu.memory_space<vmem>>, vector<128x128xf32>
    %c0_2 = arith.constant 0 : index
    %c0_3 = arith.constant 0 : index
    %4 = vector.load %arg6[%c0_2, %c0_3] : memref<128x128xf32, #tpu.memory_space<vmem>>, vector<128x128xf32>
    %c0_4 = arith.constant 0 : index
    %c0_5 = arith.constant 0 : index
    %5 = vector.load %arg5[%c0_4, %c0_5] : memref<128x128xf32, #tpu.memory_space<vmem>>, vector<128x128xf32>
    %cst = arith.constant 2.000000e+01 : f32
    %6 = vector.broadcast %cst : f32 to vector<128x128xf32>
    %7 = arith.cmpf ogt, %5, %6 : vector<128x128xf32>
    %cst_6 = arith.constant 2.000000e+01 : f32
    %8 = vector.broadcast %cst_6 : f32 to vector<128x128xf32>
    %9 = arith.minimumf %5, %8 : vector<128x128xf32>
    %10 = math.exp %9 : vector<128x128xf32>
    %11 = math.log1p %10 : vector<128x128xf32>
    %12 = arith.select %7, %5, %11 : vector<128x128xi1>, vector<128x128xf32>
    %13 = arith.mulf %4, %12 : vector<128x128xf32>
    %14 = arith.addf %3, %13 : vector<128x128xf32>
    %c0_7 = arith.constant 0 : index
    %c0_8 = arith.constant 0 : index
    %15 = vector.load %arg9[%c0_7, %c0_8] : memref<8x128xf32, #tpu.memory_space<vmem>>, vector<8x128xf32>
    %c0_9 = arith.constant 0 : index
    %c0_10 = arith.constant 0 : index
    %16 = vector.load %arg3[%c0_9, %c0_10] : memref<8x128xf32, #tpu.memory_space<vmem>>, vector<8x128xf32>
    %cst_11 = arith.constant dense<0.000000e+00> : vector<8x128xf32>
    %17 = tpu.matmul %16, %14, %cst_11 {dimension_numbers = #tpu.dot_dimension_numbers<[1], [0], [0], [1], [0, 0, 1, 1], [], []>} : vector<8x128xf32>, vector<128x128xf32>, vector<8x128xf32> -> vector<8x128xf32>
    %18 = arith.addf %15, %17 : vector<8x128xf32>
    %c0_12 = arith.constant 0 : index
    %c0_13 = arith.constant 0 : index
    %19 = vector.load %arg9[%c0_12, %c0_13] : memref<8x128xf32, #tpu.memory_space<vmem>>, vector<8x128xf32>
    tpu.vector_store %arg9[%c0_12, %c0_13], %18 {strides = array<i32>} : memref<8x128xf32, #tpu.memory_space<vmem>>, vector<8x128xf32>,
    %c0_i32_14 = arith.constant 0 : i32
    %20 = arith.cmpi eq, %arg2, %c0_i32_14 : i32
    %21 = arith.extui %20 : i1 to i32
    %c0_i32_15 = arith.constant 0 : i32
    %22 = arith.cmpi ne, %21, %c0_i32_15 : i32
    scf.if %22 {
      %c0_16 = arith.constant 0 : index
      %c0_17 = arith.constant 0 : index
      %23 = vector.load %arg9[%c0_16, %c0_17] : memref<8x128xf32, #tpu.memory_space<vmem>>, vector<8x128xf32>
      %c0_18 = arith.constant 0 : index
      %c0_19 = arith.constant 0 : index
      %24 = vector.load %arg7[%c0_18, %c0_19] : memref<1x128xf32, #tpu.memory_space<vmem>>, vector<1x128xf32>
      %25 = vector.broadcast %24 : vector<1x128xf32> to vector<8x128xf32>
      %26 = arith.addf %23, %25 : vector<8x128xf32>
      %c0_20 = arith.constant 0 : index
      %c0_21 = arith.constant 0 : index
      %27 = vector.load %arg8[%c0_20, %c0_21] : memref<8x128xf32, #tpu.memory_space<vmem>>, vector<8x128xf32>
      tpu.vector_store %arg8[%c0_20, %c0_21], %26 {strides = array<i32>} : memref<8x128xf32, #tpu.memory_space<vmem>>, vector<8x128xf32>,
    } else {
    }
    return
  }
  func.func @transform_0(%arg0: i32, %arg1: i32, %arg2: i32) -> (i32, i32) {
    %c0_i32 = arith.constant 0 : i32
    return %arg0, %arg2 : i32, i32
  }
  func.func @transform_1(%arg0: i32, %arg1: i32, %arg2: i32) -> (i32, i32) {
    %c0_i32 = arith.constant 0 : i32
    return %arg2, %arg1 : i32, i32
  }
  func.func @transform_2(%arg0: i32, %arg1: i32, %arg2: i32) -> (i32, i32) {
    %c0_i32 = arith.constant 0 : i32
    return %arg2, %arg1 : i32, i32
  }
  func.func @transform_3(%arg0: i32, %arg1: i32, %arg2: i32) -> (i32, i32) {
    %c0_i32 = arith.constant 0 : i32
    return %arg2, %arg1 : i32, i32
  }
  func.func @transform_4(%arg0: i32, %arg1: i32, %arg2: i32) -> (i32, i32) {
    %c0_i32 = arith.constant 0 : i32
    %c0_i32_0 = arith.constant 0 : i32
    return %c0_i32, %arg1 : i32, i32
  }
  func.func @transform_5(%arg0: i32, %arg1: i32, %arg2: i32) -> (i32, i32) {
    %c0_i32 = arith.constant 0 : i32
    return %arg0, %arg1 : i32, i32
  }
}

</mosaic_0001>

<bundles_post_ra>
// kernel: bbb_linear_forward.1
= control target key start
LH: loop header
LB: loop body
LE: loop exit
PB: predicated region body
PF: predicated region fallthrough
CT: control target
= control target key end

     0   :  { %v600_v0 = vmov 0.0|0.0   ;;  %vm601_vm0 = vmmov 0   ;;  %v602_v3 = vmov 0.0   ;;  %s1038_s0 = inlined_call_operand.vmem [shape: f32[8,128], index: 0, kind: input, shape index: {}]   ;;  %s1039_s1 = inlined_call_operand.vmem [shape: f32[128,128], index: 1, kind: input, shape index: {}]   ;;  %s1040_s2 = inlined_call_operand.vmem [shape: f32[128,128], index: 2, kind: input, shape index: {}]   ;;  %s1041_s3 = inlined_call_operand.vmem [shape: f32[128,128], index: 3, kind: input, shape index: {}]   ;;  %s1042_s4 = inlined_call_operand.vmem [shape: f32[1,128], index: 4, kind: input, shape index: {}]   ;;  %s1043_s5 = inlined_call_operand.hbm [shape: f32[8,128], index: 5, kind: output, shape index: {}]  }
   0x1   :  { %484 = vmatprep.subr.bf16.mxu0 %v600_v0  ;;  %v638_v1 = vld [vmem:[%s1040_s2] sm:$0xff]  ;;  %v643_v2 = vld [vmem:[%s1040_s2 + $0x8] sm:$0xff]  ;;  %481 = vmatprep.mubr.msk.f32.mxu0 %vm601_vm0, %v602_v3  ;;  %v650_v6 = vld [vmem:[%s1040_s2 + $0x10] sm:$0xff] }
   0x2   :  { %v90_v4 = vmin.f32 %v638_v1, 20.0  ;;  %v91_v5 = vmin.f32 %v643_v2, 20.0  ;;  %v655_v9 = vld [vmem:[%s1040_s2 + $0x18] sm:$0xff]  ;;  %v92_v10 = vmin.f32 %v650_v6, 20.0  ;;  %v662_v12 = vld [vmem:[%s1040_s2 + $0x20] sm:$0xff]  ;;  %v667_v13 = vld [vmem:[%s1040_s2 + $0x28] sm:$0xff] }
   0x3   :  { %v93_v11 = vmin.f32 %v655_v9, 20.0  ;;  %v94_v16 = vmin.f32 %v662_v12, 20.0  ;;  %v95_v17 = vmin.f32 %v667_v13, 20.0  ;;  %v674_v18 = vld [vmem:[%s1040_s2 + $0x30] sm:$0xff]  ;;  %v679_v19 = vld [vmem:[%s1040_s2 + $0x38] sm:$0xff]  ;;  %v686_v24 = vld [vmem:[%s1040_s2 + $0x40] sm:$0xff] }
   0x4   :  { %v106_v7 = vmul.f32 1.442695, %v90_v4  ;;  %v108_v8 = vmul.f32 1.442695, %v91_v5  ;;  %v110_v14 = vmul.f32 1.442695, %v92_v10 }
   0x5   :  { %v112_v15 = vmul.f32 1.442695, %v93_v11  ;;  %v114_v20 = vmul.f32 1.442695, %v94_v16  ;;  %v116_v21 = vmul.f32 1.442695, %v95_v17 }
   0x6   :  { %512 = vpow2.f32 %v106_v7  ;;  %v96_v22 = vmin.f32 %v674_v18, 20.0  ;;  %v97_v23 = vmin.f32 %v679_v19, 20.0  ;;  %v691_v25 = vld [vmem:[%s1040_s2 + $0x48] sm:$0xff]  ;;  %v98_v26 = vmin.f32 %v686_v24, 20.0  ;;  %v698_v31 = vld [vmem:[%s1040_s2 + $0x50] sm:$0xff]  ;;  %v703_v33 = vld [vmem:[%s1040_s2 + $0x58] sm:$0xff] }
   0x7   :  { %514 = vpow2.f32 %v108_v8  ;;  %v99_v29 = vmin.f32 %v691_v25, 20.0  ;;  %v100_v34 = vmin.f32 %v698_v31, 20.0  ;;  %v101_v47 = vmin.f32 %v703_v33, 20.0 }
   0x8   :  { %516 = vpow2.f32 %v110_v14  ;;  %v118_v27 = vmul.f32 1.442695, %v96_v22  ;;  %v120_v28 = vmul.f32 1.442695, %v97_v23  ;;  %v122_v30 = vmul.f32 1.442695, %v98_v26 }
   0x9   :  { %518 = vpow2.f32 %v112_v15  ;;  %v124_v39 = vmul.f32 1.442695, %v99_v29  ;;  %v707_v48 = vmul.f32 1.442695, %v100_v34 }
   0xa   :  { %520 = vpow2.f32 %v114_v20 }
   0xb   :  { %522 = vpow2.f32 %v116_v21 }
   0xc   :  { %524 = vpow2.f32 %v118_v27 }
   0xd   :  { %526 = vpow2.f32 %v120_v28 }
   0xe   :  { %528 = vpow2.f32 %v122_v30 }
  0x10   :  { %v513_v32 = vpop.eup %512 }
  0x11   :  { %v515_v35 = vpop.eup %514  ;;  %v138_v36 = vadd.f32 1.0, %v513_v32  ;;  %v141_v37 = vmul.f32 -0.5, %v513_v32  ;;  %v144_v38 = vand.u32 2147483647, %v513_v32 }
  0x12   :  { %v147_v40 = vadd.f32 1.0, %v515_v35  ;;  %v150_v41 = vmul.f32 -0.5, %v515_v35  ;;  %v517_v42 = vpop.eup %516  ;;  %v153_v44 = vand.u32 2147483647, %v515_v35 }
  0x13   :  { %530 = vlog2.f32 %v138_v36  ;;  %v142_v43 = vadd.f32 1.0, %v141_v37  ;;  %v519_v45 = vpop.eup %518  ;;  %v156_v46 = vadd.f32 1.0, %v517_v42  ;;  %vm709_vm1 = vcmp.lt.f32.partialorder %v144_v38, 0.0004427343 }
  0x14   :  { %532 = vlog2.f32 %v147_v40  ;;  %v159_v50 = vmul.f32 -0.5, %v517_v42  ;;  %v162_v51 = vand.u32 2147483647, %v517_v42  ;;  %v165_v52 = vadd.f32 1.0, %v519_v45 }
  0x15   :  { %534 = vpow2.f32 %v124_v39 }
  0x16   :  { %10 = vsyncpa [#allocation4], 0  ;;  %v521_v53 = vpop.eup %520  ;;  %vm74_vm2 = vcmp.gt.f32.partialorder %v638_v1, 20.0  ;;  %v151_v54 = vadd.f32 1.0, %v150_v41  ;;  %536 = vlog2.f32 %v156_v46  ;;  %v168_v55 = vmul.f32 -0.5, %v519_v45  ;;  %v42_v40 = vld [vmem:[%s1041_s3] sm:$0xff] }
  0x17   :  { %v171_v56 = vand.u32 2147483647, %v519_v45  ;;  %v523_v57 = vpop.eup %522  ;;  %vm75_vm3 = vcmp.gt.f32.partialorder %v643_v2, 20.0  ;;  %v143_v58 = vmul.f32 %v513_v32, %v142_v43  ;;  %vm715_vm4 = vcmp.lt.f32.partialorder %v153_v44, 0.0004427343  ;;  %v43_v46 = vld [vmem:[%s1041_s3 + $0x8] sm:$0xff] }
  0x18   :  { %538 = vlog2.f32 %v165_v52  ;;  %v174_v60 = vadd.f32 1.0, %v521_v53  ;;  %v160_v61 = vadd.f32 1.0, %v159_v50  ;;  %vm719_vm5 = vcmp.lt.f32.partialorder %v162_v51, 0.0004427343  ;;  %v525_v4 = vpop.eup %524  ;;  %v46_v14 = vld [vmem:[%s1041_s3 + $0x20] sm:$0xff] }
  0x19   :  { %v169_v63 = vadd.f32 1.0, %v168_v55  ;;  %v177_v3 = vmul.f32 -0.5, %v521_v53  ;;  %vm76_vm6 = vcmp.gt.f32.partialorder %v650_v6, 20.0  ;;  %v180_v5 = vand.u32 2147483647, %v521_v53  ;;  %v724_v10 = vpop.eup %526  ;;  %v26_v55 = vld [vmem:[%s1039_s1] sm:$0xff] }
  0x1a   :  { %540 = vlog2.f32 %v174_v60  ;;  %v183_v7 = vadd.f32 1.0, %v523_v57  ;;  %v186_v8 = vmul.f32 -0.5, %v523_v57  ;;  %v152_v11 = vmul.f32 %v515_v35, %v151_v54  ;;  %v731_v22 = vpop.eup %528  ;;  %v27_v60 = vld [vmem:[%s1039_s1 + $0x8] sm:$0xff] }
  0x1b   :  { %vm77_vm7 = vcmp.gt.f32.partialorder %v655_v9, 20.0  ;;  %vm727_vm8 = vcmp.lt.f32.partialorder %v171_v56, 0.0004427343  ;;  %v178_v15 = vadd.f32 1.0, %v177_v3  ;;  %v189_v16 = vand.u32 2147483647, %v523_v57 }
  0x1c   :  { %542 = vlog2.f32 %v183_v7  ;;  %v187_v17 = vadd.f32 1.0, %v186_v8  ;;  %v192_v20 = vadd.f32 1.0, %v525_v4  ;;  %v195_v21 = vmul.f32 -0.5, %v525_v4 }
  0x1d   :  { %v161_v23 = vmul.f32 %v517_v42, %v160_v61  ;;  %v170_v26 = vmul.f32 %v519_v45, %v169_v63  ;;  %vm78_vm9 = vcmp.gt.f32.partialorder %v662_v12, 20.0  ;;  %v198_v27 = vand.u32 2147483647, %v525_v4  ;;  %v531_v29 = vpop.eup %530 }
  0x1e   :  { %v201_v28 = vadd.f32 1.0, %v724_v10  ;;  %vm735_vm10 = vcmp.lt.f32.partialorder %v180_v5, 0.0004427343  ;;  %544 = vlog2.f32 %v192_v20  ;;  %v196_v32 = vadd.f32 1.0, %v195_v21  ;;  %v533_v35 = vpop.eup %532  ;;  %v45_v5 = vld [vmem:[%s1041_s3 + $0x18] sm:$0xff] }
  0x1f   :  { %v204_v34 = vmul.f32 -0.5, %v724_v10  ;;  %v140_v36 = vmul.f32 0.6931472, %v531_v29  ;;  %vm79_vm11 = vcmp.gt.f32.partialorder %v667_v13, 20.0  ;;  %v179_v37 = vmul.f32 %v521_v53, %v178_v15  ;;  %v742_v39 = vpop.eup %534  ;;  %v28_v15 = vld [vmem:[%s1039_s1 + $0x10] sm:$0xff] }
  0x20   :  { %546 = vlog2.f32 %v201_v28  ;;  %v207_v38 = vand.u32 2147483647, %v724_v10  ;;  %v149_v41 = vmul.f32 0.6931472, %v533_v35  ;;  %v188_v42 = vmul.f32 %v523_v57, %v187_v17  ;;  %v537_v45 = vpop.eup %536 }
  0x21   :  { %vm747_vm12 = vcmp.lt.f32.partialorder %v189_v16, 0.0004427343  ;;  %v210_v44 = vadd.f32 1.0, %v731_v22  ;;  %v146_v50 = vsel %vm709_vm1, %v143_v58, %v140_v36  ;;  %vm80_vm13 = vcmp.gt.f32.partialorder %v674_v18, 20.0 }
  0x22   :  { %v758_v51 = vmul.f32 %v525_v4, %v196_v32  ;;  %vm760_vm14 = vcmp.lt.f32.partialorder %v198_v27, 0.0004427343  ;;  %v205_v53 = vadd.f32 1.0, %v204_v34  ;;  %v539_v54 = vpop.eup %538  ;;  %v155_v56 = vsel %vm715_vm4, %v152_v11, %v149_v41 }
  0x23   :  { %v282_v49 = vsel %vm74_vm2, %v638_v1, %v146_v50  ;;  %v158_v57 = vmul.f32 0.6931472, %v537_v45  ;;  %vm81_vm15 = vcmp.gt.f32.partialorder %v679_v19, 20.0  ;;  %vm773_vm0 = vcmp.lt.f32.partialorder %v207_v38, 0.0004427343  ;;  %v44_v1 = vld [vmem:[%s1041_s3 + $0x10] sm:$0xff] }
  0x24   :  { %v283_v59 = vsel %vm75_vm3, %v643_v2, %v155_v56  ;;  %v298_v61 = vmul.f32 %v282_v49, %v42_v40  ;;  %v167_v63 = vmul.f32 0.6931472, %v539_v54  ;;  %548 = vlog2.f32 %v210_v44  ;;  %v541_v3 = vpop.eup %540  ;;  %v47_v40 = vld [vmem:[%s1041_s3 + $0x28] sm:$0xff]  ;;  %v49_v49 = vld [vmem:[%s1041_s3 + $0x38] sm:$0xff] }
  0x25   :  { %v299_v4 = vmul.f32 %v283_v59, %v43_v46  ;;  %v164_v7 = vsel %vm719_vm5, %v161_v23, %v158_v57  ;;  %v213_v8 = vmul.f32 -0.5, %v731_v22  ;;  %v216_v2 = vand.u32 2147483647, %v731_v22  ;;  %v29_v23 = vld [vmem:[%s1039_s1 + $0x18] sm:$0xff]  ;;  %v31_v50 = vld [vmem:[%s1039_s1 + $0x28] sm:$0xff]  ;;  %v32_v57 = vld [vmem:[%s1039_s1 + $0x30] sm:$0xff] }
  0x26   :  { %v314_v11 = vadd.f32 %v298_v61, %v26_v55  ;;  %v173_v16 = vsel %vm727_vm8, %v170_v26, %v167_v63  ;;  %v284_v17 = vsel %vm76_vm6, %v650_v6, %v164_v7  ;;  %v176_v20 = vmul.f32 0.6931472, %v541_v3  ;;  %v543_v21 = vpop.eup %542 }
  0x27   :  { %v315_v62 = vadd.f32 %v299_v4, %v27_v60  ;;  %v285_v27 = vsel %vm77_vm7, %v655_v9, %v173_v16  ;;  %v300_v28 = vmul.f32 %v284_v17, %v44_v1  ;;  %v206_v26 = vmul.f32 %v724_v10, %v205_v53  ;;  %v30_v9 = vld [vmem:[%s1039_s1 + $0x20] sm:$0xff]  ;;  %v888_v17 = vld [vmem:[%s1040_s2 + $0x78] sm:$0xff] }
  0x28   :  { %v301_v29 = vmul.f32 %v285_v27, %v45_v5  ;;  %v182_v6 = vsel %vm735_vm10, %v179_v37, %v176_v20  ;;  %v185_v32 = vmul.f32 0.6931472, %v543_v21  ;;  %v219_v34 = vadd.f32 1.0, %v742_v39  ;;  %v545_v35 = vpop.eup %544 }
  0x29   :  { %v485_v36 = vpack.c.bf16 %v315_v62, %v314_v11  ;;  %v316_v38 = vadd.f32 %v300_v28, %v28_v15  ;;  %v286_v10 = vsel %vm78_vm9, %v662_v12, %v182_v6  ;;  %v214_v30 = vadd.f32 1.0, %v213_v8  ;;  %v48_v12 = vld [vmem:[%s1041_s3 + $0x30] sm:$0xff]  ;;  %v50_v62 = vld [vmem:[%s1041_s3 + $0x40] sm:$0xff] }
  0x2a   :  { %v547_v37 = vpop.eup %546  ;;  %v317_v41 = vadd.f32 %v301_v29, %v29_v23  ;;  %v191_v44 = vsel %vm747_vm12, %v188_v42, %v185_v32  ;;  %v302_v45 = vmul.f32 %v286_v10, %v46_v14  ;;  %v194_v46 = vmul.f32 0.6931472, %v545_v35  ;;  %v880_v11 = vld [vmem:[%s1040_s2 + $0x70] sm:$0xff]  ;;  %v35_v10 = vld [vmem:[%s1039_s1 + $0x48] sm:$0xff] }
  0x2b   :  { %486 = vmatpush3.bf16.msra.mxu0 %v485_v36  ;;  %v287_v53 = vsel %vm79_vm11, %v667_v13, %v191_v44  ;;  %v203_v54 = vmul.f32 0.6931472, %v547_v37  ;;  %550 = vlog2.f32 %v219_v34  ;;  %v222_v43 = vmul.f32 -0.5, %v742_v39 }
  0x2c   :  { %487 = vmatprep.subr.bf16.mxu0 %v600_v0  ;;  %v488_v42 = vpack.c.bf16 %v317_v41, %v316_v38  ;;  %v303_v55 = vmul.f32 %v287_v53, %v47_v40  ;;  %v318_v56 = vadd.f32 %v302_v45, %v30_v9  ;;  %v200_v13 = vsel %vm760_vm14, %v758_v51, %v194_v46  ;;  %v33_v51 = vld [vmem:[%s1039_s1 + $0x38] sm:$0xff]  ;;  %v51_v38 = vld [vmem:[%s1041_s3 + $0x48] sm:$0xff] }
  0x2d   :  { %v209_v60 = vsel %vm773_vm0, %v206_v26, %v203_v54  ;;  %v288_v59 = vsel %vm80_vm13, %v674_v18, %v200_v13  ;;  %v215_v61 = vmul.f32 %v731_v22, %v214_v30  ;;  %vm851_vm1 = vcmp.lt.f32.partialorder %v216_v2, 0.0004427343  ;;  %v865_v18 = vld [vmem:[%s1040_s2 + $0x60] sm:$0xff] }
  0x2e   :  { %v549_v63 = vpop.eup %548  ;;  %v319_v52 = vadd.f32 %v303_v55, %v31_v50  ;;  %v289_v58 = vsel %vm81_vm15, %v679_v19, %v209_v60  ;;  %v304_v3 = vmul.f32 %v288_v59, %v48_v12  ;;  %552 = vpow2.f32 %v707_v48  ;;  %v873_v19 = vld [vmem:[%s1040_s2 + $0x68] sm:$0xff] }
  0x2f   :  { %489 = vmatpush3.bf16.msra.mxu0 %v488_v42  ;;  %v305_v22 = vmul.f32 %v289_v58, %v49_v49  ;;  %vm82_vm2 = vcmp.gt.f32.partialorder %v686_v24, 20.0  ;;  %v212_v4 = vmul.f32 0.6931472, %v549_v63  ;;  %v128_v5 = vmul.f32 1.442695, %v101_v47 }
  0x30   :  { %490 = vmatprep.subr.bf16.mxu0 %v600_v0  ;;  %v491_v48 = vpack.c.bf16 %v319_v52, %v318_v56  ;;  %v320_v7 = vadd.f32 %v304_v3, %v32_v57  ;;  %v223_v8 = vadd.f32 1.0, %v222_v43  ;;  %v225_v2 = vand.u32 2147483647, %v742_v39 }
  0x31   :  { %v321_v15 = vadd.f32 %v305_v22, %v33_v51  ;;  %v218_v47 = vsel %vm851_vm1, %v215_v61, %v212_v4  ;;  %554 = vpow2.f32 %v128_v5  ;;  %v102_v16 = vmin.f32 %v865_v18, 20.0  ;;  %v52_v5 = vld [vmem:[%s1041_s3 + $0x50] sm:$0xff] }
  0x32   :  { %v103_v20 = vmin.f32 %v873_v19, 20.0  ;;  %v290_v23 = vsel %vm82_vm2, %v686_v24, %v218_v47  ;;  %v104_v28 = vmin.f32 %v880_v11, 20.0  ;;  %v224_v14 = vmul.f32 %v742_v39, %v223_v8  ;;  %v34_v39 = vld [vmem:[%s1039_s1 + $0x40] sm:$0xff] }
  0x33   :  { %492 = vmatpush3.bf16.msra.mxu0 %v491_v48  ;;  %v494_v21 = vpack.c.bf16 %v321_v15, %v320_v7  ;;  %v130_v27 = vmul.f32 1.442695, %v102_v16  ;;  %v105_v29 = vmin.f32 %v888_v17, 20.0  ;;  %vm83_vm3 = vcmp.gt.f32.partialorder %v691_v25, 20.0  ;;  %v431_v16 = vld [vmem:[%s1042_s4] ss:$0 sm:$0xff] }
  0x34   :  { %493 = vmatprep.subr.bf16.mxu0 %v600_v0  ;;  %v132_v26 = vmul.f32 1.442695, %v103_v20  ;;  %vm902_vm4 = vcmp.lt.f32.partialorder %v225_v2, 0.0004427343  ;;  %v134_v34 = vmul.f32 1.442695, %v104_v28  ;;  %v306_v35 = vmul.f32 %v290_v23, %v50_v62 }
  0x35   :  { %v551_v6 = vpop.eup %550  ;;  %556 = vpow2.f32 %v130_v27  ;;  %v136_v36 = vmul.f32 1.442695, %v105_v29  ;;  %vm84_vm6 = vcmp.gt.f32.partialorder %v698_v31, 20.0  ;;  %vm85_vm8 = vcmp.gt.f32.partialorder %v703_v33, 20.0  ;;  %v36_v28 = vld [vmem:[%s1039_s1 + $0x50] sm:$0xff] }
  0x36   :  { %v221_v24 = vmul.f32 0.6931472, %v551_v6  ;;  %558 = vpow2.f32 %v132_v26  ;;  %v322_v44 = vadd.f32 %v306_v35, %v34_v39  ;;  %vm86_vm9 = vcmp.gt.f32.partialorder %v865_v18, 20.0  ;;  %v37_v35 = vld [vmem:[%s1039_s1 + $0x58] sm:$0xff] }
  0x37   :  { %495 = vmatpush3.bf16.msra.mxu0 %v494_v21  ;;  %560 = vpow2.f32 %v134_v34  ;;  %vm87_vm12 = vcmp.gt.f32.partialorder %v873_v19, 20.0  ;;  %vm88_vm14 = vcmp.gt.f32.partialorder %v880_v11, 20.0  ;;  %vm89_vm0 = vcmp.gt.f32.partialorder %v888_v17, 20.0 }
  0x38   :  { %v553_v9 = vpop.eup %552  ;;  %496 = vmatprep.subr.bf16.mxu0 %v600_v0  ;;  %v227_v40 = vsel %vm902_vm4, %v224_v14, %v221_v24  ;;  %562 = vpow2.f32 %v136_v36  ;;  %v53_v14 = vld [vmem:[%s1041_s3 + $0x58] sm:$0xff] }
  0x39   :  { %v291_v30 = vsel %vm83_vm3, %v691_v25, %v227_v40  ;;  %v228_v37 = vadd.f32 1.0, %v553_v9  ;;  %v231_v50 = vmul.f32 -0.5, %v553_v9  ;;  %v234_v25 = vand.u32 2147483647, %v553_v9 }
  0x3a   :  { %v307_v41 = vmul.f32 %v291_v30, %v51_v38 }
  0x3b   :  { %v555_v45 = vpop.eup %554  ;;  %564 = vlog2.f32 %v228_v37  ;;  %v232_v55 = vadd.f32 1.0, %v231_v50  ;;  %vm925_vm5 = vcmp.lt.f32.partialorder %v234_v25, 0.0004427343 }
  0x3c   :  { %v323_v46 = vadd.f32 %v307_v41, %v35_v10  ;;  %v237_v53 = vadd.f32 1.0, %v555_v45  ;;  %v240_v43 = vmul.f32 -0.5, %v555_v45  ;;  %v243_v61 = vand.u32 2147483647, %v555_v45 }
  0x3d   :  { %v233_v63 = vmul.f32 %v553_v9, %v232_v55 }
  0x3e   :  { %v497_v12 = vpack.c.bf16 %v323_v46, %v322_v44  ;;  %566 = vlog2.f32 %v237_v53  ;;  %v241_v59 = vadd.f32 1.0, %v240_v43  ;;  %vm935_vm7 = vcmp.lt.f32.partialorder %v243_v61, 0.0004427343  ;;  %v55_v53 = vld [vmem:[%s1041_s3 + $0x68] sm:$0xff] }
  0x3f   :  { %v557_v54 = vpop.eup %556 }
  0x40   :  { %v559_v42 = vpop.eup %558  ;;  %498 = vmatpush3.bf16.msra.mxu0 %v497_v12  ;;  %v246_v56 = vadd.f32 1.0, %v557_v54  ;;  %v249_v1 = vmul.f32 -0.5, %v557_v54  ;;  %v242_v48 = vmul.f32 %v555_v45, %v241_v59  ;;  %v252_v8 = vand.u32 2147483647, %v557_v54  ;;  %v54_v45 = vld [vmem:[%s1041_s3 + $0x60] sm:$0xff]  ;;  %v39_v59 = vld [vmem:[%s1039_s1 + $0x68] sm:$0xff] }
  0x41   :  { %v561_v49 = vpop.eup %560  ;;  %499 = vmatprep.subr.bf16.mxu0 %v600_v0  ;;  %v255_v13 = vadd.f32 1.0, %v559_v42  ;;  %v258_v52 = vmul.f32 -0.5, %v559_v42  ;;  %v261_v2 = vand.u32 2147483647, %v559_v42 }
  0x42   :  { %v922_v57 = vpop.eup %562  ;;  %568 = vlog2.f32 %v246_v56  ;;  %v264_v60 = vadd.f32 1.0, %v561_v49  ;;  %v267_v22 = vmul.f32 -0.5, %v561_v49  ;;  %v250_v7 = vadd.f32 1.0, %v249_v1 }
  0x43   :  { %570 = vlog2.f32 %v255_v13  ;;  %v273_v51 = vadd.f32 1.0, %v922_v57  ;;  %v259_v20 = vadd.f32 1.0, %v258_v52  ;;  %v276_v21 = vmul.f32 -0.5, %v922_v57 }
  0x44   :  { %572 = vlog2.f32 %v264_v60  ;;  %v268_v27 = vadd.f32 1.0, %v267_v22  ;;  %v270_v29 = vand.u32 2147483647, %v561_v49  ;;  %v251_v32 = vmul.f32 %v557_v54, %v250_v7 }
  0x45   :  { %v565_v58 = vpop.eup %564  ;;  %574 = vlog2.f32 %v273_v51  ;;  %vm951_vm10 = vcmp.lt.f32.partialorder %v252_v8, 0.0004427343  ;;  %vm955_vm11 = vcmp.lt.f32.partialorder %v261_v2, 0.0004427343  ;;  %v260_v39 = vmul.f32 %v559_v42, %v259_v20  ;;  %v38_v42 = vld [vmem:[%s1039_s1 + $0x60] sm:$0xff] }
  0x46   :  { %v230_v4 = vmul.f32 0.6931472, %v565_v58  ;;  %v277_v38 = vadd.f32 1.0, %v276_v21  ;;  %v279_v9 = vand.u32 2147483647, %v922_v57  ;;  %v269_v41 = vmul.f32 %v561_v49, %v268_v27  ;;  %v56_v49 = vld [vmem:[%s1041_s3 + $0x70] sm:$0xff] }
  0x47   :  { %vm968_vm13 = vcmp.lt.f32.partialorder %v270_v29, 0.0004427343  ;;  %v40_v58 = vld [vmem:[%s1039_s1 + $0x70] sm:$0xff] }
  0x48   :  { %v567_v15 = vpop.eup %566  ;;  %v236_v47 = vsel %vm925_vm5, %v233_v63, %v230_v4  ;;  %v278_v25 = vmul.f32 %v922_v57, %v277_v38  ;;  %vm990_vm15 = vcmp.lt.f32.partialorder %v279_v9, 0.0004427343 }
  0x49   :  { %v239_v62 = vmul.f32 0.6931472, %v567_v15  ;;  %v292_v23 = vsel %vm84_vm6, %v698_v31, %v236_v47  ;;  %v331_v47 = vld [vmem:[%s1038_s0] sm:$0xff] }
  0x4a   :  { %v308_v26 = vmul.f32 %v292_v23, %v52_v5 }
  0x4b   :  { %v245_v6 = vsel %vm935_vm7, %v242_v48, %v239_v62 }
  0x4c   :  { %v569_v24 = vpop.eup %568  ;;  %v293_v36 = vsel %vm85_vm8, %v703_v33, %v245_v6  ;;  %v324_v30 = vadd.f32 %v308_v26, %v36_v28 }
  0x4d   :  { %v571_v40 = vpop.eup %570  ;;  %v309_v10 = vmul.f32 %v293_v36, %v53_v14  ;;  %v248_v37 = vmul.f32 0.6931472, %v569_v24 }
  0x4e   :  { %v573_v44 = vpop.eup %572  ;;  %v257_v46 = vmul.f32 0.6931472, %v571_v40 }
  0x4f   :  { %v325_v33 = vadd.f32 %v309_v10, %v37_v35  ;;  %v254_v12 = vsel %vm951_vm10, %v251_v32, %v248_v37  ;;  %v266_v54 = vmul.f32 0.6931472, %v573_v44  ;;  %v575_v43 = vpop.eup %574 }
  0x50   :  { %v263_v55 = vsel %vm955_vm11, %v260_v39, %v257_v46  ;;  %v294_v56 = vsel %vm86_vm9, %v865_v18, %v254_v12  ;;  %v275_v57 = vmul.f32 0.6931472, %v575_v43 }
  0x51   :  { %v500_v60 = vpack.c.bf16 %v325_v33, %v324_v30  ;;  %v295_v61 = vsel %vm87_vm12, %v873_v19, %v263_v55  ;;  %v310_v18 = vmul.f32 %v294_v56, %v54_v45  ;;  %v272_v1 = vsel %vm968_vm13, %v269_v41, %v266_v54  ;;  %v57_v19 = vld [vmem:[%s1041_s3 + $0x78] sm:$0xff] }
  0x52   :  { %v311_v63 = vmul.f32 %v295_v61, %v55_v53  ;;  %v296_v52 = vsel %vm88_vm14, %v880_v11, %v272_v1  ;;  %v281_v4 = vsel %vm990_vm15, %v278_v25, %v275_v57  ;;  %v41_v11 = vld [vmem:[%s1039_s1 + $0x78] sm:$0xff]  ;;  %s603_s1 = smov [#allocation3]  }
  0x53   :  { %501 = vmatpush3.bf16.msra.mxu0 %v500_v60  ;;  %v326_v51 = vadd.f32 %v310_v18, %v38_v42  ;;  %v312_v3 = vmul.f32 %v296_v52, %v56_v49  ;;  %v297_v5 = vsel %vm89_vm0, %v888_v17, %v281_v4  ;;  %s423_s15 = sshll.u32 %s603_s1, 4  ;;  %s424_s15 = int_to_ptr.vmem [resolvable:$true] %s423_s15 }
  0x54   :  { %502 = vmatprep.subr.bf16.mxu0 %v600_v0  ;;  %v327_v22 = vadd.f32 %v311_v63, %v39_v59  ;;  %v313_v7 = vmul.f32 %v297_v5, %v57_v19  ;;  %s576_s16 = scalar_lea.vmem %s424_s15, 128  ;;  %p581_p1 = scmp.lt.s32.totalorder %s424_s15, %s424_s15 }
  0x55   :  { %v328_v8 = vadd.f32 %v312_v3, %v40_v58  ;;  %p577_p0 = scmp.ne.s32.totalorder %s424_s15, %s576_s16  ;;  %p582_p2 = scmp.lt.s32.totalorder %s576_s16, %s576_s16 }
  0x56   :  { %v503_v48 = vpack.c.bf16 %v327_v22, %v326_v51  ;;  %v329_v2 = vadd.f32 %v313_v7, %v41_v11 }
  0x57   :  { %p583_p3 = por %p582_p2, %p581_p1 }
  0x58   :  { %504 = vmatpush3.bf16.msra.mxu0 %v503_v48  ;;  %v506_v15 = vpack.c.bf16 %v329_v2, %v328_v8 }
  0x59   :  { %505 = vmatprep.subr.bf16.mxu0 %v600_v0  ;;  %p584_p4 = pnand %p583_p3, %p577_p0 }
  0x5c   :  { %507 = vmatpush3.bf16.msra.mxu0 %v506_v15 }
  0x5f   :  { %482 = vmatmul.mubr.f32.vlgmr.msra.gmra.mrb[0].mxu0 %v331_v47 }
 0x132   :  { %v398_v17 = vpop.f32.mrb[0].mxu0 }
 0x133   :  { %v415_v20 = vadd.f32 %v431_v16, %v398_v17  ;;  %v483_v21 = vpop.f32.mrb[1].mxu0 }
 0x135   :  { %416 = vst [vmem:[#allocation3] sm:$0xff] %v415_v20 }
 0x136   :  { %587 = shalt.err (!%p584_p4)
}
 0x137   :  { %s588_s18 = scalar_lea.hbm %s1043_s5, 128 }
 0x138   :  { %p589_p5 = scmp.ne.s32.totalorder %s1043_s5, %s588_s18  ;;  %p592_p6 = scmp.lt.u32.totalorder %s588_s18, %s1043_s5 }
 0x13a   :  { %p594_p7 = pnand %p592_p6, %p589_p5 }
 0x13c   :  { %597 = shalt.err (!%p594_p7)
}
 0x13d   :  { %426 = dma.vmem_to_hbm [thread:$0]  %s424_s15, 128, %s1043_s5, [#allocation4]  }
 0x13e   :  { %598 = dma.done.wait [#allocation4], 128  }
 0x13f   :  { %599 = vsyncadd [#allocation4], 4294967168 }
 0x140   :  { %430 = vsyncpa [#allocation4], 1 }

</bundles_post_ra>
